<compile_context>
chip_gen: v7x
topology: tpu7x:2x2x1
jax: 0.10.0
libtpu: 0.0.40
codegen_flags: <defaults>
</compile_context>

<pallas_src>
import functools

import jax
import jax.numpy as jnp
from jax.experimental import pallas as pl
from jax.experimental.pallas import tpu as pltpu


# ----------------------------------------------------------------------------- kernel


def _causal_conv1d_kernel(x_ref, w_ref, y_ref, win_ref, *,
                          kernel_size: int, block_s: int, n_s_tiles: int):
    # x_ref:   (1, tS, tD)           current time tile (unpadded)
    # w_ref:   (K, tD)               depthwise taps, tap index on sublanes
    # y_ref:   (1, tS, tD)
    # win_ref: (1, tS + K - 1, tD)   VMEM window scratch: [history | current tile]
    K = kernel_size
    tS = block_s
    halo = K - 1
    tD = win_ref.shape[-1]
    s = pl.program_id(2)

    # ---- causal history for the first `halo` rows of the window --------------
    if halo > 0:
        if n_s_tiles > 1:
            @pl.when(s > 0)
            def _():
                # last K-1 time rows of the previous tile become this tile's history
                win_ref[:, 0:halo, :] = win_ref[:, tS:tS + halo, :]

            @pl.when(s == 0)
            def _():
                win_ref[:, 0:halo, :] = jnp.zeros((1, halo, tD), dtype=win_ref.dtype)
        else:
            win_ref[:, 0:halo, :] = jnp.zeros((1, halo, tD), dtype=win_ref.dtype)

    # ---- place the current tile after the history -----------------------------
    win_ref[:, halo:halo + tS, :] = x_ref[...]

    # ---- single hoisted load; K shifted VPU MACs from static slices -----------
    xw = win_ref[...].astype(jnp.float32)          # (1, tS + K - 1, tD)
    w = w_ref[...].astype(jnp.float32)             # (K, tD)

    acc = xw[:, 0:tS, :] * w[0][None, None, :]     # init from k=0 product
    for k in range(1, K):                          # K is small & static -> unrolled
        acc = acc + xw[:, k:k + tS, :] * w[k][None, None, :]

    y_ref[...] = acc.astype(y_ref.dtype)


# ----------------------------------------------------------------------------- tiling


def _vmem_limit_bytes() -> int:
    cap = None
    try:
        info = pltpu.get_tpu_info()
        cap = getattr(info, "vmem_capacity_bytes", None)
    except Exception:
        cap = None
    if not cap:
        cap = 64 * 1024 * 1024  # conservative default: v7x physical VMEM per core
    return int(min(cap // 2, 64 * 1024 * 1024))


def _select_tiles(S: int, D: int, K: int, itemsize: int, vmem_limit: int):
    # Per-element VMEM footprint: double-buffered in+out blocks (4*itemsize),
    # window scratch (~itemsize) and f32 in-kernel temporaries (~(K+2)*4 bytes).
    bytes_per_elem = 5 * itemsize + 4 * (K + 2)
    budget = int(vmem_limit * 0.6)
    cap_elems = max(budget // bytes_per_elem, 8 * 128)

    # Lane (channel) tile: multiple of 128 when possible, else full extent
    # (required by the (8,128) BlockSpec rule).
    if D % 128 == 0:
        if D <= 1024:
            tD = D
        else:
            tD = 128
            for cand in (1024, 512, 256):
                if D % cand == 0:
                    tD = cand
                    break
    else:
        tD = D

    # Time (sublane) tile: multiple of 8 dividing S, big enough to carry the halo.
    halo = K - 1
    max_ts = max(cap_elems // tD, 8)
    if S <= max_ts:
        tS = S
    else:
        tS = None
        t = (max_ts // 8) * 8
        while t >= 8:
            if S % t == 0 and t >= halo:
                tS = t
                break
            t -= 8
        if tS is None:
            tS = S  # rare: no suitable divisor -> single time tile
    return tS, tD


# ----------------------------------------------------------------------------- wrapper


def causal_conv1d(x: jax.Array, weight: jax.Array, *,
                  block_s: int | None = None, block_d: int | None = None) -> jax.Array:
    """x: (B, S, D); weight: (D, K) depthwise taps (PyTorch conv.weight[d, 0, k])."""
    B, S, D = x.shape
    Dw, K = weight.shape
    assert Dw == D, "weight must be (feature_dim, kernel_size)"
    halo = K - 1
    itemsize = jnp.dtype(x.dtype).itemsize

    vmem_limit = _vmem_limit_bytes()
    auto_ts, auto_td = _select_tiles(S, D, K, itemsize, vmem_limit)
    tS = block_s if block_s is not None else auto_ts
    tD = block_d if block_d is not None else auto_td
    assert S % tS == 0 and D % tD == 0, "tile sizes must divide (S, D)"
    n_s_tiles = S // tS
    assert n_s_tiles == 1 or tS >= halo, "time tile must cover the K-1 halo"

    # Tap index first so w[k] broadcasts over lanes (channels) per tap.
    w_kd = jnp.transpose(weight, (1, 0))  # (K, D)

    kernel = functools.partial(_causal_conv1d_kernel,
                               kernel_size=K, block_s=tS, n_s_tiles=n_s_tiles)

    grid = (B, D // tD, n_s_tiles)

    return pl.pallas_call(
        kernel,
        out_shape=jax.ShapeDtypeStruct((B, S, D), x.dtype),
        grid_spec=pltpu.PrefetchScalarGridSpec(
            num_scalar_prefetch=0,
            grid=grid,
            in_specs=[
                pl.BlockSpec((1, tS, tD), lambda b, d, s: (b, s, d)),
                pl.BlockSpec((K, tD), lambda b, d, s: (0, d)),
            ],
            out_specs=pl.BlockSpec((1, tS, tD), lambda b, d, s: (b, s, d)),
            scratch_shapes=[pltpu.VMEM((1, tS + halo, tD), x.dtype)],
        ),
        compiler_params=pltpu.CompilerParams(
            dimension_semantics=("parallel", "parallel", "arbitrary"),
            vmem_limit_bytes=vmem_limit,
        ),
        cost_estimate=pl.CostEstimate(
            flops=2 * B * S * D * K,
            transcendentals=0,
            bytes_accessed=2 * B * S * D * itemsize
                           + D * K * jnp.dtype(weight.dtype).itemsize,
        ),
    )(x, w_kd)


# ----------------------------------------------------------------------------- reference


def causal_conv1d_reference(x: jax.Array, weight: jax.Array) -> jax.Array:
    """Plain-JAX reference matching PyTorch F.conv1d(groups=D) on left-padded input."""
    B, S, D = x.shape
    _, K = weight.shape
    x_pad = jnp.pad(x, ((0, 0), (K - 1, 0), (0, 0)))
    y = jnp.zeros((B, S, D), dtype=jnp.float32)
    for k in range(K):
        y = y + x_pad[:, k:k + S, :] * weight[:, k][None, None, :]
    return y.astype(x.dtype)


if __name__ == "__main__":
    # Small shapes consistent with the module: batch=2, seq=16, feature_dim=32, K=4.
    B, S, D, K = 2, 16, 32, 4

    key = jax.random.PRNGKey(0)
    kx, kw = jax.random.split(key)
    x = jax.random.normal(kx, (B, S, D), dtype=jnp.float32)

    # nn.Conv1d default init scale: U(-1/sqrt(fan_in), 1/sqrt(fan_in)), fan_in = K
    # for a depthwise conv (bias=False).
    bound = 1.0 / (K ** 0.5)
    weight = jax.random.uniform(kw, (D, K), dtype=jnp.float32,
                                minval=-bound, maxval=bound)

    y = jax.block_until_ready(causal_conv1d(x, weight))
    y_ref = causal_conv1d_reference(x, weight)
    assert y.shape == (B, S, D)
    assert jnp.allclose(y, y_ref, atol=1e-5, rtol=1e-5), "mismatch (single time tile)"

    # Also exercise the time-tiled path (carried K-1-row halo across time tiles).
    S2 = 64
    x2 = jax.random.normal(jax.random.PRNGKey(1), (B, S2, D), dtype=jnp.float32)
    y2 = jax.block_until_ready(causal_conv1d(x2, weight, block_s=16))
    y2_ref = causal_conv1d_reference(x2, weight)
    assert jnp.allclose(y2, y2_ref, atol=1e-5, rtol=1e-5), "mismatch (tiled time + halo)"

    print("KERNEL_OK")
</pallas_src>

<mosaic_0001>
module attributes {stable_mosaic.version = 11 : i64} {
  func.func @_causal_conv1d_kernel(%arg0: i32, %arg1: i32, %arg2: i32, %arg3: memref<1x16x32xf32, #tpu.memory_space<vmem>>, %arg4: memref<4x32xf32, #tpu.memory_space<vmem>>, %arg5: memref<1x16x32xf32, #tpu.memory_space<vmem>>, %arg6: memref<1x19x32xf32, #tpu.memory_space<vmem>>) attributes {dimension_semantics = [#tpu.dimension_semantics<parallel>, #tpu.dimension_semantics<parallel>, #tpu.dimension_semantics<arbitrary>], iteration_bounds = array<i64: 2, 1, 1>, scalar_prefetch = 0 : i64, scratch_operands = 1 : i64, tpu.core_type = #tpu.core_type<tc>, window_params = [{transform_indices = @transform_0, window_bounds = array<i64: 1, 16, 32>}, {transform_indices = @transform_1, window_bounds = array<i64: 4, 32>}, {transform_indices = @transform_2, window_bounds = array<i64: 1, 16, 32>}]} {
    %cst = arith.constant 0.000000e+00 : f32
    %0 = vector.broadcast %cst : f32 to vector<1x3x32xf32>
    %c0 = arith.constant 0 : index
    %c0_0 = arith.constant 0 : index
    %c0_1 = arith.constant 0 : index
    %1 = vector.load %arg6[%c0, %c0_0, %c0_1] : memref<1x19x32xf32, #tpu.memory_space<vmem>>, vector<1x3x32xf32>
    tpu.vector_store %arg6[%c0, %c0_0, %c0_1], %0 {strides = array<i32>} : memref<1x19x32xf32, #tpu.memory_space<vmem>>, vector<1x3x32xf32>,
    %c0_2 = arith.constant 0 : index
    %c0_3 = arith.constant 0 : index
    %c0_4 = arith.constant 0 : index
    %2 = vector.load %arg3[%c0_2, %c0_3, %c0_4] : memref<1x16x32xf32, #tpu.memory_space<vmem>>, vector<1x16x32xf32>
    %c0_5 = arith.constant 0 : index
    %c3 = arith.constant 3 : index
    %c0_6 = arith.constant 0 : index
    %3 = vector.load %arg6[%c0_5, %c3, %c0_6] : memref<1x19x32xf32, #tpu.memory_space<vmem>>, vector<1x16x32xf32>
    tpu.vector_store %arg6[%c0_5, %c3, %c0_6], %2 {strides = array<i32>} : memref<1x19x32xf32, #tpu.memory_space<vmem>>, vector<1x16x32xf32>,
    %c0_7 = arith.constant 0 : index
    %c0_8 = arith.constant 0 : index
    %c0_9 = arith.constant 0 : index
    %4 = vector.load %arg6[%c0_7, %c0_8, %c0_9] : memref<1x19x32xf32, #tpu.memory_space<vmem>>, vector<1x19x32xf32>
    %c0_10 = arith.constant 0 : index
    %c0_11 = arith.constant 0 : index
    %5 = vector.load %arg4[%c0_10, %c0_11] : memref<4x32xf32, #tpu.memory_space<vmem>>, vector<4x32xf32>
    %6 = vector.extract_strided_slice %4 {offsets = [0, 0, 0], sizes = [1, 16, 32], strides = [1, 1, 1]} : vector<1x19x32xf32> to vector<1x16x32xf32>
    %7 = vector.extract_strided_slice %5 {offsets = [0, 0], sizes = [1, 32], strides = [1, 1]} : vector<4x32xf32> to vector<1x32xf32>
    %8 = vector.shape_cast %7 : vector<1x32xf32> to vector<32xf32>
    %9 = vector.shape_cast %8 : vector<32xf32> to vector<1x1x32xf32>
    %10 = vector.broadcast %9 : vector<1x1x32xf32> to vector<1x16x32xf32>
    %11 = arith.mulf %6, %10 : vector<1x16x32xf32>
    %12 = vector.extract_strided_slice %4 {offsets = [0, 1, 0], sizes = [1, 16, 32], strides = [1, 1, 1]} : vector<1x19x32xf32> to vector<1x16x32xf32>
    %13 = vector.extract_strided_slice %5 {offsets = [1, 0], sizes = [1, 32], strides = [1, 1]} : vector<4x32xf32> to vector<1x32xf32>
    %14 = vector.shape_cast %13 : vector<1x32xf32> to vector<32xf32>
    %15 = vector.shape_cast %14 : vector<32xf32> to vector<1x1x32xf32>
    %16 = vector.broadcast %15 : vector<1x1x32xf32> to vector<1x16x32xf32>
    %17 = arith.mulf %12, %16 : vector<1x16x32xf32>
    %18 = arith.addf %11, %17 : vector<1x16x32xf32>
    %19 = vector.extract_strided_slice %4 {offsets = [0, 2, 0], sizes = [1, 16, 32], strides = [1, 1, 1]} : vector<1x19x32xf32> to vector<1x16x32xf32>
    %20 = vector.extract_strided_slice %5 {offsets = [2, 0], sizes = [1, 32], strides = [1, 1]} : vector<4x32xf32> to vector<1x32xf32>
    %21 = vector.shape_cast %20 : vector<1x32xf32> to vector<32xf32>
    %22 = vector.shape_cast %21 : vector<32xf32> to vector<1x1x32xf32>
    %23 = vector.broadcast %22 : vector<1x1x32xf32> to vector<1x16x32xf32>
    %24 = arith.mulf %19, %23 : vector<1x16x32xf32>
    %25 = arith.addf %18, %24 : vector<1x16x32xf32>
    %26 = vector.extract_strided_slice %4 {offsets = [0, 3, 0], sizes = [1, 16, 32], strides = [1, 1, 1]} : vector<1x19x32xf32> to vector<1x16x32xf32>
    %27 = vector.extract_strided_slice %5 {offsets = [3, 0], sizes = [1, 32], strides = [1, 1]} : vector<4x32xf32> to vector<1x32xf32>
    %28 = vector.shape_cast %27 : vector<1x32xf32> to vector<32xf32>
    %29 = vector.shape_cast %28 : vector<32xf32> to vector<1x1x32xf32>
    %30 = vector.broadcast %29 : vector<1x1x32xf32> to vector<1x16x32xf32>
    %31 = arith.mulf %26, %30 : vector<1x16x32xf32>
    %32 = arith.addf %25, %31 : vector<1x16x32xf32>
    %c0_12 = arith.constant 0 : index
    %c0_13 = arith.constant 0 : index
    %c0_14 = arith.constant 0 : index
    %33 = vector.load %arg5[%c0_12, %c0_13, %c0_14] : memref<1x16x32xf32, #tpu.memory_space<vmem>>, vector<1x16x32xf32>
    tpu.vector_store %arg5[%c0_12, %c0_13, %c0_14], %32 {strides = array<i32>} : memref<1x16x32xf32, #tpu.memory_space<vmem>>, vector<1x16x32xf32>,
    return
  }
  func.func @transform_0(%arg0: i32, %arg1: i32, %arg2: i32) -> (i32, i32, i32) {
    %c0_i32 = arith.constant 0 : i32
    return %arg0, %arg2, %arg1 : i32, i32, i32
  }
  func.func @transform_1(%arg0: i32, %arg1: i32, %arg2: i32) -> (i32, i32) {
    %c0_i32 = arith.constant 0 : i32
    %c0_i32_0 = arith.constant 0 : i32
    return %c0_i32, %arg1 : i32, i32
  }
  func.func @transform_2(%arg0: i32, %arg1: i32, %arg2: i32) -> (i32, i32, i32) {
    %c0_i32 = arith.constant 0 : i32
    return %arg0, %arg2, %arg1 : i32, i32, i32
  }
}

</mosaic_0001>

<bundles_post_ra>
// kernel: tpu_custom_call.1
= control target key start
LH: loop header
LB: loop body
LE: loop exit
PB: predicated region body
PF: predicated region fallthrough
CT: control target
= control target key end

     0   :  { %7 = vsyncpa [#allocation4], 0  ;;  %s915_s0 = inlined_call_operand.hbm [shape: f32[2,16,32], index: 0, kind: input, shape index: {}]   ;;  %s916_s1 = inlined_call_operand.hbm [shape: f32[4,32], index: 1, kind: input, shape index: {}]   ;;  %s917_s2 = inlined_call_operand.hbm [shape: f32[2,16,32], index: 2, kind: output, shape index: {}]  }
   0x1   :  { %9 = vsyncpa [#allocation4 + $0x1], 0 }
   0x2   :  { %10 = vsyncpa [#allocation7], 0 }
   0x3   :  { %11 = vsyncpa [#allocation5], 0 }
   0x4   :  { %13 = vsyncpa [#allocation5 + $0x1], 0  ;;  %s680_s9 = smov 0   ;;  %s682_s10 = smov 0  }
   0x5   :  { %s684_s11 = smov 0   ;;  %s686_s12 = smov 0  }
   0x6   :  { %s688_s13 = smov 0   ;;  %s690_s14 = smov 0  }
   0x7 LB: > { %s414_s15 = sadd.s32 4294967295, %s655_s14   ;;  %s415_s16 = sadd.s32 4294967294, %s655_s14   ;;  %s655_s14 = sphi %s690_s14, %s19_s14   ;;  %s651_s13 = sphi %s688_s13, %s945_s13   ;;  %s647_s12 = sphi %s686_s12, %s944_s12   ;;  %s643_s11 = sphi %s684_s11, %s943_s11   ;;  %s639_s10 = sphi %s682_s10, %s942_s10   ;;  %s635_s9 = sphi %s680_s9, %s941_s9  }
   0x8   : > { %s49_s17 = sadd.s32 1, %s643_s11  ;;  %p56_p0 = scmp.ne.s32.totalorder %s643_s11, %s639_s10 }
   0x9   : > { %p57_p1 = scmp.eq.s32.totalorder %s655_s14, 0  ;;  %p62_p2 = scmp.ne.s32.totalorder %s639_s10, %s635_s9 }
   0xa   : > { %p718_p3 = scmp.eq.s32.totalorder %s414_s15, 0  ;;  %p116_p4 = scmp.eq.s32.totalorder %s414_s15, 1 }
   0xb   : > { %p722_p5 = por %p57_p1, %p56_p0  ;;  %p122_p6 = scmp.eq.s32.totalorder %s415_s16, 1 }
   0xc   : > { %s924_s18 = scalar_select %p718_p3, 1, 0 }
   0xd   : > { %p728_p7 = por %p718_p3, %p62_p2  ;;  %p732_p8 = por %p116_p4, %p56_p0 }
   0xe   : > { %p736_p9 = por %p122_p6, %p62_p2  ;;  %p416_p10 = scmp.ge.s32.totalorder %s655_s14, 1 }
   0xf   : > { %s926_s20 = scalar_select %p728_p7, 1, 0 }
  0x10   : > { %s927_s21 = scalar_select %p732_p8, 1, 0 }
  0x11   : > { %s928_s22 = scalar_select %p736_p9, 1, 0 }
  0x12   : > { %p129_p11 = scmp.lt.s32.totalorder %s655_s14, 3  ;;  %s657_s24 = smov [#allocation6]  }
  0x13   : > { %s144_s25 = sshll.u32 %s657_s24, 4  ;;  %p454_p1 = scmp.lt.s32.totalorder %s655_s14, 2  ;;  %s145_s25 = int_to_ptr.vmem [resolvable:$true] %s144_s25 }
  0x14   : > { %p743_p13 = pnand %p416_p10, %p129_p11  ;;  %s38_s28 = sadd.s32 1, %s651_s13 }
  0x15   : > { %p752_p4 = pnand %p454_p1, %p722_p5  ;;  %p763_p6 = scmp.ge.s32.totalorder %s38_s28, 2 }
  0x16   : > { %s929_s23 = scalar_select %p743_p13, 1, 0 }
  0x17   : > { %p441_p0 = pneg %p743_p13  ;;  %s155_s30 = sand.u32 1, %s643_s11  }
  0x18   : > { %s930_s26 = scalar_select %p752_p4, 1, 0 }
  0x19   : > { %p758_p2 = pnand %p441_p0, %p718_p3  ;;  %s511_s5 = scalar_lea.hbm %s916_s1, 64 }
  0x1a   : > { %s932_s29 = scalar_select %p763_p6, 1, 0 }
  0x1b   : > { %p512_p5 = scmp.ne.s32.totalorder %s916_s1, %s511_s5  ;;  %p513_p10 = pneg %p758_p2 }
  0x1c   : > { %p518_p0 = scmp.lt.u32.totalorder %s511_s5, %s916_s1 }
  0x1d   : > { %p514_p11 = pnand %p513_p10, %p512_p5 }
  0x1f   : > { %p515_p1 = pneg %p514_p11 }
  0x21   : > { %p520_p12 = pnand %p518_p0, %p515_p1 }
  0x23   : > { %523 = shalt.err (!%p520_p12)
}
  0x24   : > { %s524_s16 = scalar_lea.vmem %s145_s25, 64  ;;  %p532_p7 = scmp.lt.s32.totalorder %s145_s25, %s145_s25 }
  0x25   : > { %p525_p9 = scmp.ne.s32.totalorder %s145_s25, %s524_s16  ;;  %p533_p13 = scmp.lt.s32.totalorder %s524_s16, %s524_s16 }
  0x27   : > { %p527_p8 = pnand %p525_p9, %p513_p10  ;;  %p534_p4 = por %p533_p13, %p532_p7 }
  0x29   : > { %p528_p3 = pneg %p527_p8 }
  0x2b   : > { %p535_p6 = pnand %p534_p4, %p528_p3 }
  0x2d   : > { %538 = shalt.err (!%p535_p6)
}
  0x2e   : > { %444 = dma.hbm_to_vmem [thread:$0]  (!%p758_p2), %s916_s1, 64, %s145_s25, [#allocation7]  }
  0x2f   : > { %p933_p9 = scmp.ne.s32.totalorder %s932_s29, 0  ;;  %s419_s3 = sshll.u32 %s155_s30, 4 }
  0x30   : > { %s431_s5 = sshll.u32 %s651_s13, 8  ;;  %s159_s8 = scalar_lea.vmem [#allocation3], %s419_s3 }
  0x31   : > { %s947_s28 = smov (%p933_p9, %s38_s28), 0  ;;  %s794_s7 = scalar_lea.hbm %s915_s0, %s431_s5 }
  0x32   : > { %s42_s4 = ssub.s32 %s651_s13, %s947_s28  ;;  %s169_s15 = sshll.u32 %s159_s8, 4  ;;  %s801_s15 = int_to_ptr.vmem [resolvable:$true] %s169_s15 }
  0x33   : > { %p47_p3 = scmp.eq.s32.totalorder %s42_s4, 0  ;;  %s803_s29 = scalar_lea.sflag [#allocation4], %s155_s30 }
  0x34   : > { %s539_s16 = scalar_lea.hbm %s794_s7, 256  ;;  %p934_p8 = scmp.ne.s32.totalorder %s930_s26, 0 }
  0x35   : > { %s799_s25 = scalar_select %p47_p3, %s643_s11, %s49_s17  }
  0x36   : > { %p540_p7 = scmp.ne.s32.totalorder %s794_s7, %s539_s16  ;;  %p541_p12 = pneg %p934_p8 }
  0x37   : > { %s544_s3 = scalar_lea.hbm %s915_s0, 512  ;;  %p545_p2 = scmp.lt.u32.totalorder %s794_s7, %s915_s0 }
  0x38   : > { %p542_p13 = pnand %p541_p12, %p540_p7  ;;  %p546_p6 = scmp.lt.u32.totalorder %s544_s3, %s539_s16 }
  0x39   : > { %p548_p10 = scmp.lt.u32.totalorder %s539_s16, %s794_s7 }
  0x3a   : > { %p543_p4 = pneg %p542_p13  ;;  %p547_p5 = por %p546_p6, %p545_p2 }
  0x3c   : > { %p549_p11 = por %p548_p10, %p547_p5 }
  0x3e   : > { %p550_p1 = pnand %p549_p11, %p543_p4 }
  0x40   : > { %553 = shalt.err (!%p550_p1)
}
  0x41   : > { %s554_s17 = scalar_lea.vmem %s801_s15, 256  ;;  %s658_s30 = smov [#allocation3]  }
  0x42   : > { %p555_p0 = scmp.ne.s32.totalorder %s801_s15, %s554_s17  ;;  %s559_s27 = sshll.u32 %s658_s30, 4  ;;  %s560_s27 = int_to_ptr.vmem [resolvable:$false] %s559_s27 }
  0x43   : > { %s561_s6 = scalar_lea.vmem %s560_s27, 512  ;;  %p562_p7 = scmp.lt.s32.totalorder %s801_s15, %s560_s27 }
  0x44   : > { %p557_p9 = pnand %p555_p0, %p541_p12  ;;  %p563_p13 = scmp.lt.s32.totalorder %s561_s6, %s554_s17 }
  0x46   : > { %p558_p3 = pneg %p557_p9  ;;  %p564_p2 = por %p563_p13, %p562_p7 }
  0x48   : > { %p565_p6 = pnand %p564_p2, %p558_p3 }
  0x4a   : > { %568 = shalt.err (!%p565_p6)
}
  0x4b   : > { %s659_s8 = smov 128   ;;  %s660_s16 = smov 8  }
  0x4c   : > { %448 = dma.hbm_to_vmem [thread:$0]  (!%p934_p8), %s794_s7, 256, %s801_s15, %s803_s29, %s659_s8, %s659_s8, %s660_s16  }
  0x4d   : > { %p935_p12 = scmp.ne.s32.totalorder %s929_s23, 0 }
  0x4e   : > { %s834_s19 = sand.u32 (!%p935_p12), 1, %s639_s10   ;;  %p936_p4 = scmp.ne.s32.totalorder (!%p935_p12), %s926_s20, 0 }
  0x4f   : > { %181 = sbr.rel (%p935_p12) target bundleno = 127 (0x7f), region = 28  ;;  %s423_s24 = sshll.u32 (!%p935_p12), %s834_s19, 4 }
  0x50   : > { %s184_s3 = scalar_lea.sflag (!%p935_p12), [#allocation4], %s834_s19  ;;  %s187_s4 = scalar_lea.vmem (!%p935_p12), [#allocation3], %s423_s24 }
  0x56   : > { %622 = dma.done.wait (%p936_p4), %s184_s3, 256  }
  0x57   : > { %624 = vsyncadd (%p936_p4), %s184_s3, 4294967040  ;;  %p937_p8 = scmp.ne.s32.totalorder %s924_s18, 0 }
  0x59   : > { %626 = dma.done.wait (%p937_p8), [#allocation7], 64  }
  0x5a   : > { %628 = vsyncadd (%p937_p8), [#allocation7], 4294967232  ;;  %vm214_vm0 = vcmask 256000   ;;  %v225_v0 = vlaneseq  ;;  %v661_v1 = vmov 0.0   ;;  %vm218_vm1 = vcmask 261120   ;;  %v216_v3 = vld [vmem:[%s187_s4] sm:$0xff] }
  0x5b   : > { %215 = vst.msk [vmem:[#allocation2] sm:$0x7] %vm214_vm0, %v661_v1  ;;  %v217_v4 = vld [vmem:[%s187_s4 + $0x8] sm:$0xff]  ;;  %v224_v7 = vld [vmem:[#allocation6] sm:$0xf]  ;;  %vm241_vm2 = vcmask 1046528  }
  0x5c   : > { %v226_v2 = vshrl.u32 %v225_v0, 7  ;;  %219 = vst.msk [vmem:[#allocation2 + $0x3] sm:$0xff] %vm218_vm1, %v216_v3  ;;  %220 = vst.msk [vmem:[#allocation2 + $0xb] sm:$0xff] %vm218_vm1, %v217_v4  ;;  %vm261_vm3 = vcmask 1045504   ;;  %vm281_vm4 = vcmask 1044480   ;;  %s211_s18 = scalar_lea.vmem [#allocation8], %s423_s24 }
  0x5d   : > { %s310_s20 = sshll.u32 %s211_s18, 4  ;;  %s432_s23 = sshll.u32 %s647_s12, 8  ;;  %s858_s20 = int_to_ptr.vmem [resolvable:$true] %s310_s20 }
  0x5e   : > { %v233_v5 = vsub.s32 1, %v226_v2  ;;  %v253_v6 = vsub.s32 2, %v226_v2  ;;  %v273_v8 = vsub.s32 3, %v226_v2  ;;  %v227_v9 = vsub.s32 0, %v226_v2  ;;  %s864_s15 = scalar_lea.hbm %s917_s2, %s432_s23  ;;  %s294_s12 = scalar_lea.sflag [#allocation5], %s834_s19 }
  0x5f   : > { %s569_s29 = scalar_lea.vmem %s858_s20, 256  ;;  %p938_p10 = scmp.ne.s32.totalorder %s927_s21, 0 }
  0x60   : > { %v234_v10 = vrot.slane %v224_v7, %v233_v5  ;;  %v254_v11 = vrot.slane %v224_v7, %v253_v6  ;;  %v274_v12 = vrot.slane %v224_v7, %v273_v8  ;;  %v228_v15 = vrot.slane %v224_v7, %v227_v9  ;;  %p570_p5 = scmp.ne.s32.totalorder %s858_s20, %s569_s29  ;;  %s662_s5 = smov [#allocation8]  }
  0x61   : > { %s573_s17 = sshll.u32 %s662_s5, 4  ;;  %s574_s17 = int_to_ptr.vmem [resolvable:$false] %s573_s17 }
  0x62   : > { %p571_p11 = pnand %p570_p5, %p938_p10  ;;  %s575_s30 = scalar_lea.vmem %s574_s17, 512 }
  0x63   : > { %v221_v13 = vld [vmem:[#allocation2] sm:$0xff]  ;;  %v222_v14 = vld [vmem:[#allocation2 + $0x8] sm:$0xff]  ;;  %v223_v16 = vld [vmem:[#allocation2 + $0x10] sm:$0x7]  ;;  %p576_p0 = scmp.lt.s32.totalorder %s858_s20, %s574_s17  ;;  %p577_p9 = scmp.lt.s32.totalorder %s575_s30, %s569_s29 }
  0x64   : > { %v235_v17 = vmul.f32 %v234_v10, %v221_v13  ;;  %v236_v18 = vmul.f32 %v234_v10, %v222_v14  ;;  %v255_v19 = vmul.f32 %v254_v11, %v221_v13  ;;  %v256_v20 = vmul.f32 %v254_v11, %v222_v14  ;;  %p572_p1 = pneg %p571_p11 }
  0x65   : > { %v275_v21 = vmul.f32 %v274_v12, %v221_v13  ;;  %v276_v22 = vmul.f32 %v274_v12, %v222_v14  ;;  %v237_v26 = vmul.f32 %v234_v10, %v223_v16  ;;  %v229_v27 = vmul.f32 %v228_v15, %v221_v13  ;;  %p578_p3 = por %p577_p9, %p576_p0 }
  0x66   : > { %v242_v23 = vrot.slane %v235_v17, 1  ;;  %v243_v24 = vrot.slane %v236_v18, 1  ;;  %v262_v25 = vrot.slane %v255_v19, 2  ;;  %v263_v28 = vrot.slane %v256_v20, 2 }
  0x67   : > { %v282_v29 = vrot.slane %v275_v21, 3  ;;  %v257_v30 = vmul.f32 %v254_v11, %v223_v16  ;;  %v283_v32 = vrot.slane %v276_v22, 3  ;;  %v245_v33 = vrot.slane %v237_v26, 1  ;;  %p579_p7 = pnand %p578_p3, %p572_p1 }
  0x68   : > { %v244_v31 = vsel %vm241_vm2, %v242_v23, %v243_v24  ;;  %v277_v34 = vmul.f32 %v274_v12, %v223_v16  ;;  %v230_v36 = vmul.f32 %v228_v15, %v222_v14  ;;  %v264_v38 = vsel %vm261_vm3, %v262_v25, %v263_v28 }
  0x69   : > { %v249_v35 = vadd.f32 %v244_v31, %v229_v27  ;;  %v265_v37 = vrot.slane %v257_v30, 2  ;;  %v246_v39 = vsel %vm241_vm2, %v243_v24, %v245_v33  ;;  %v284_v43 = vsel %vm281_vm4, %v282_v29, %v283_v32 }
  0x6a   : > { %v285_v40 = vrot.slane %v277_v34, 3  ;;  %v250_v42 = vadd.f32 %v246_v39, %v230_v36 }
  0x6b   : > { %v269_v41 = vadd.f32 %v264_v38, %v249_v35  ;;  %v266_v44 = vsel %vm261_vm3, %v263_v28, %v265_v37 }
  0x6c   : > { %v270_v46 = vadd.f32 %v266_v44, %v250_v42  ;;  %v286_v47 = vsel %vm281_vm4, %v283_v32, %v285_v40 }
  0x6d   : > { %v289_v45 = vadd.f32 %v284_v43, %v269_v41 }
  0x6e   : > { %v290_v48 = vadd.f32 %v286_v47, %v270_v46 }
  0x6f   : > { %291 = vst.msk [vmem:[%s211_s18] sm:$0xff] %vm218_vm1, %v289_v45 }
  0x70   : > { %292 = vst.msk [vmem:[%s211_s18 + $0x8] sm:$0xff] %vm218_vm1, %v290_v48 }
  0x71   : > { %582 = shalt.err (!%p579_p7)
}
  0x72   : > { %s583_s27 = scalar_lea.hbm %s864_s15, 256  ;;  %s587_s16 = scalar_lea.hbm %s917_s2, 512 }
  0x73   : > { %p584_p13 = scmp.ne.s32.totalorder %s864_s15, %s583_s27  ;;  %p588_p12 = scmp.lt.u32.totalorder %s864_s15, %s917_s2 }
  0x74   : > { %p589_p4 = scmp.lt.u32.totalorder %s587_s16, %s583_s27  ;;  %p591_p5 = scmp.lt.u32.totalorder %s583_s27, %s864_s15 }
  0x75   : > { %p585_p2 = pnand %p584_p13, %p938_p10 }
  0x76   : > { %p590_p8 = por %p589_p4, %p588_p12 }
  0x77   : > { %p586_p6 = pneg %p585_p2 }
  0x78   : > { %p592_p11 = por %p591_p5, %p590_p8 }
  0x7a   : > { %p593_p1 = pnand %p592_p11, %p586_p6 }
  0x7c   : > { %596 = shalt.err (!%p593_p1)
}
  0x7d   : > { %s663_s4 = smov 128   ;;  %s664_s18 = smov 8  }
  0x7e   : > { %439 = dma.vmem_to_hbm [thread:$0]  (%p938_p10), %s858_s20, 256, %s864_s15, %s294_s12, %s663_s4, %s663_s4, %s664_s18  }
  0x7f PF: > { %s325_s23 = sand.u32 1, %s635_s9   ;;  %p939_p0 = scmp.ne.s32.totalorder %s928_s22, 0 }
  0x80   : > { %p940_p9 = scmp.ge.s32.totalorder %s655_s14, 2  ;;  %s326_s26 = scalar_lea.sflag [#allocation5], %s325_s23 }
  0x82   : > { %p450_p3 = pnand %p940_p9, %p939_p0 }
  0x84   : > { %630 = dma.done.wait (!%p450_p3), %s326_s26, 256  }
  0x85   : > { %632 = vsyncadd (!%p450_p3), %s326_s26, 4294967040  ;;  %s19_s14 = sadd.s32 1, %s655_s14   ;;  %s941_s9 = smov %s639_s10 }
  0x86   : > { %p16_p7 = scmp.ge.s32.totalorder %s19_s14, 4   ;;  %s942_s10 = smov %s643_s11 }
  0x87   : > { %s943_s11 = smov %s799_s25  ;;  %s944_s12 = smov %s651_s13 }
  0x88   : > { %s945_s13 = smov %s947_s28  ;;  %18 = sbr.rel (!%p16_p7) target bundleno = 7 (0x7), region = 78 }
  0x8f   :  { %331 = vsyncpa [#allocation4], 1 }
  0x90   :  { %333 = vsyncpa [#allocation4 + $0x1], 1 }
  0x91   :  { %334 = vsyncpa [#allocation7], 1 }
  0x92   :  { %335 = vsyncpa [#allocation5], 1 }
  0x93   :  { %337 = vsyncpa [#allocation5 + $0x1], 1 }

</bundles_post_ra>
